<compile_context>
chip_gen: v5e
topology: v5e:2x2
jax: 0.10.0
libtpu: 0.0.40
codegen_flags: <defaults>
</compile_context>

<pallas_src>
import functools

import jax
import jax.numpy as jnp
from jax.experimental import pallas as pl
from jax.experimental.pallas import tpu as pltpu


def _cam_kernel(gamma_ref, x_ref, o_ref, enr_ref, *,
                compute_dtype, num_n, row_block, approx_recip):
    phase = pl.program_id(1)
    n = pl.program_id(2)

    x = x_ref[...]                          # (bB, C, tN), input dtype
    xc = x.astype(compute_dtype)            # MXU operand dtype (bf16 default)
    x32 = x.astype(jnp.float32)             # residual in f32

    @pl.when(phase == 0)
    def _accumulate_energy():
        # energy += x @ x^T, contracting the shared last (N-tile) dim of both
        # operands directly (q@k.T pattern: no materialized transpose).
        g = jnp.einsum("bcn,bdn->bcd", xc, xc,
                       preferred_element_type=jnp.float32)
        if num_n == 1:
            enr_ref[...] = g
        else:
            # Fold the init into the first tile: no zero-fill + load-add RMW.
            @pl.when(n == 0)
            def _():
                enr_ref[...] = g

            @pl.when(n > 0)
            def _():
                enr_ref[...] += g

    def _attention_rows(energy, gamma):
        # softmax(rowmax(E) - E) == softmax(-E); stable form exp(rowmin - E).
        row_min = jnp.min(energy, axis=-1, keepdims=True)
        e = jnp.exp(row_min - energy)
        denom = jnp.sum(e, axis=-1, keepdims=True)
        if approx_recip:
            inv = pl.reciprocal(denom, approx=True)
        else:
            inv = 1.0 / denom
        # gamma is folded into the attention once per batch block; exact for
        # gamma == 0 (the module's init value): 0 @ x + x == x.
        return (e * inv) * gamma

    @pl.when(jnp.logical_and(phase == 1, n == 0))
    def _softmax_and_first_matmul():
        gamma = gamma_ref[0]
        C = enr_ref.shape[1]
        if row_block is None or row_block >= C:
            attn = _attention_rows(enr_ref[...], gamma)
            if num_n > 1:
                enr_ref[...] = attn          # later N tiles reuse it
            out = jnp.einsum("bcd,bdn->bcn", attn.astype(compute_dtype), xc,
                             preferred_element_type=jnp.float32)
            o_ref[...] = (out + x32).astype(o_ref.dtype)
        else:
            # Row-blocked: EUP/XLU softmax of row-block r+1 can overlap the
            # MXU matmul of row-block r (out rows depend only on attn rows).
            for r in range(C // row_block):
                rs = slice(r * row_block, (r + 1) * row_block)
                attn_r = _attention_rows(enr_ref[:, rs, :], gamma)
                if num_n > 1:
                    enr_ref[:, rs, :] = attn_r
                out_r = jnp.einsum("bcd,bdn->bcn",
                                   attn_r.astype(compute_dtype), xc,
                                   preferred_element_type=jnp.float32)
                o_ref[:, rs, :] = (out_r + x32[:, rs, :]).astype(o_ref.dtype)

    @pl.when(jnp.logical_and(phase == 1, n > 0))
    def _apply_attention():
        attn = enr_ref[...].astype(compute_dtype)       # gamma already folded
        out = jnp.einsum("bcd,bdn->bcn", attn, xc,
                         preferred_element_type=jnp.float32)
        o_ref[...] = (out + x32).astype(o_ref.dtype)


def _default_vmem_limit():
    # Per-generation budget: ~96 MiB of v5e/v6e's 128 MiB VMEM (maximize the
    # N slab -> single HBM read of x); ~38 MiB of v7x's 64 MiB per-TC VMEM.
    try:
        cap = int(pltpu.get_tpu_info().vmem_capacity_bytes)
    except Exception:
        return 48 * (1 << 20)
    if not cap or cap <= 0:
        return 48 * (1 << 20)
    if cap >= 96 * (1 << 20):
        return 96 * (1 << 20)
    return max(16 * (1 << 20), min(38 * (1 << 20), int(cap * 0.6)))


def cam_module(x, gamma, *, compute_dtype=jnp.bfloat16, block_b=None,
               block_n=None, vmem_limit_bytes=None, approx_recip=True):
    """CAM_Module forward.  x: (B, C, H, W); gamma: (1,) -> (B, C, H, W)."""
    B, C, H, W = x.shape
    N = H * W
    elt = jnp.dtype(x.dtype).itemsize
    c_elt = jnp.dtype(compute_dtype).itemsize

    if vmem_limit_bytes is None:
        vmem_limit_bytes = _default_vmem_limit()

    x_flat = x.reshape(B, C, N)
    gamma = jnp.asarray(gamma, jnp.float32).reshape(1)

    # ---- batch packing -----------------------------------------------------
    # Pack several batch elements per grid step when C is small (tiny CxC
    # matmuls: the kernel is per-step-overhead / DMA bound, not MXU bound).
    if block_b is None:
        block_b = max(1, min(B, 256 // max(C, 1)))
        if B >= 2:                        # v7x megacore: >= 2 batch blocks
            block_b = min(block_b, max(1, B // 2))
    block_b = max(1, min(int(block_b), B))
    while B % block_b:
        block_b -= 1

    # ---- VMEM budget ---------------------------------------------------
    budget = int(vmem_limit_bytes) - 2 * (1 << 20)        # compiler scratch

    def acc_bytes(bb):          # f32 accumulator (+ ~2x for softmax temps)
        return bb * C * C * 4

    def col_bytes(bb):          # bytes per resident N column:
        # 2x double-buffered in tile + 2x out tile + f32 `out` temp + cast
        return bb * C * (4 * elt + 4 + c_elt)

    n_pad = ((N + 127) // 128) * 128     # lane-dense (unmasked) stores

    if block_n is None:
        # Prefer the whole (C, N) slab resident: phase 1 reuses the phase-0 x
        # tile, so x is read from HBM once.  Shrink block_b before block_n —
        # num_n (not block_b) sets how often the accumulator RMW happens,
        # which is the tight slot on v5e's single vector-store port.
        def full_slab_fits(bb):
            return 3 * acc_bytes(bb) + col_bytes(bb) * n_pad <= budget

        while block_b > 1 and not full_slab_fits(block_b):
            block_b -= 1
            while B % block_b:
                block_b -= 1

        avail = budget - 3 * acc_bytes(block_b)
        max_tn = max(128, avail // max(col_bytes(block_b), 1))
        if max_tn >= n_pad:
            block_n = n_pad
        else:
            target = max(128, (max_tn // 128) * 128)
            m = n_pad // 128
            d = min(m, target // 128)
            while d > 1 and m % d:
                d -= 1
            d = max(d, 1)
            if 2 * 128 * d >= target:    # a reasonable divisor exists
                block_n = 128 * d
            else:                        # pad further instead of tiny tiles
                block_n = target
                n_pad = ((n_pad + target - 1) // target) * target
    else:
        block_n = int(block_n)
        n_pad = ((N + block_n - 1) // block_n) * block_n
        if block_n != n_pad and block_n % 128:
            raise ValueError("block_n must be a multiple of 128 or cover N")
    num_n = n_pad // block_n

    if n_pad != N:
        # Zero padding is exact: zero columns contribute nothing to the Gram
        # matrix or to attention @ x; padded output columns are sliced off.
        x_flat = jnp.pad(x_flat, ((0, 0), (0, 0), (0, n_pad - N)))

    # Row-block the phase-1 softmax only for large C (hide the EUP bubble).
    row_block = 256 if (C >= 512 and C % 256 == 0) else None

    kernel = functools.partial(_cam_kernel, compute_dtype=compute_dtype,
                               num_n=num_n, row_block=row_block,
                               approx_recip=approx_recip)

    out_flat = pl.pallas_call(
        kernel,
        out_shape=jax.ShapeDtypeStruct((B, C, n_pad), x.dtype),
        grid_spec=pltpu.PrefetchScalarGridSpec(
            num_scalar_prefetch=0,
            grid=(B // block_b, 2, num_n),
            in_specs=[
                pl.BlockSpec(memory_space=pltpu.MemorySpace.SMEM),   # gamma
                pl.BlockSpec((block_b, C, block_n),
                             lambda b, p, n: (b, 0, n)),             # x tile
            ],
            # Phase 0 pins the output index at (b, 0, 0) and never stores, so
            # nothing is written back; phase 1 writes each tile exactly once.
            out_specs=pl.BlockSpec((block_b, C, block_n),
                                   lambda b, p, n: (b, 0, n * p)),
            scratch_shapes=[pltpu.VMEM((block_b, C, C), jnp.float32)],
        ),
        compiler_params=pltpu.CompilerParams(
            dimension_semantics=("parallel", "arbitrary", "arbitrary"),
            vmem_limit_bytes=int(vmem_limit_bytes)),
    )(gamma, x_flat)

    if n_pad != N:
        out_flat = out_flat[:, :, :N]
    return out_flat.reshape(B, C, H, W)


def cam_reference(x, gamma):
    """Plain-JAX reference matching the PyTorch forward semantics."""
    B, C, H, W = x.shape
    xf = x.reshape(B, C, H * W).astype(jnp.float32)
    energy = jnp.einsum("bcn,bdn->bcd", xf, xf)
    energy_new = jnp.max(energy, axis=-1, keepdims=True) - energy
    attn = jax.nn.softmax(energy_new, axis=-1)
    out = jnp.einsum("bcd,bdn->bcn", attn, xf).reshape(B, C, H, W)
    return jnp.asarray(gamma, jnp.float32).reshape(())[...] * out + x


if __name__ == "__main__":
    key = jax.random.PRNGKey(0)
    x = jax.random.normal(key, (2, 4, 16, 16), dtype=jnp.float32)

    # The module initializes gamma to zeros(1); use a nonzero value so the
    # attention path is actually exercised by the correctness checks.
    gamma = jnp.full((1,), 0.5, dtype=jnp.float32)
    ref = cam_reference(x, gamma)

    # 1) Exact-mode validation: f32 MXU operands + exact reciprocal.
    out_f32 = jax.block_until_ready(
        cam_module(x, gamma, compute_dtype=jnp.float32, approx_recip=False))
    assert out_f32.shape == (2, 4, 16, 16)
    assert jnp.allclose(out_f32, ref, atol=1e-3, rtol=1e-3), \
        float(jnp.max(jnp.abs(out_f32 - ref)))

    # 2) Multi-N-tile path (energy accumulation + phase-1 n>0 branch).
    out_tiled = jax.block_until_ready(
        cam_module(x, gamma, compute_dtype=jnp.float32, approx_recip=False,
                   block_n=128))
    assert jnp.allclose(out_tiled, ref, atol=1e-3, rtol=1e-3), \
        float(jnp.max(jnp.abs(out_tiled - ref)))

    # 3) Non-128-divisible spatial size: exercises the zero-pad / slice path.
    x_odd = jax.random.normal(jax.random.PRNGKey(1), (2, 4, 15, 15),
                              dtype=jnp.float32)
    out_odd = jax.block_until_ready(
        cam_module(x_odd, gamma, compute_dtype=jnp.float32,
                   approx_recip=False))
    ref_odd = cam_reference(x_odd, gamma)
    assert jnp.allclose(out_odd, ref_odd, atol=1e-3, rtol=1e-3), \
        float(jnp.max(jnp.abs(out_odd - ref_odd)))

    # 4) Production default path (bf16 MXU operands, approx reciprocal):
    #    check it runs, has the right shape and is finite.  (bf16 Gram errors
    #    are exp-amplified, so tight comparison is done on the f32 path.)
    out_def = jax.block_until_ready(cam_module(x, gamma))
    assert out_def.shape == (2, 4, 16, 16)
    assert bool(jnp.all(jnp.isfinite(out_def)))

    # 5) gamma == 0 (the actual init value) must reduce to the input exactly,
    #    even on the bf16 default path (gamma is folded into the attention).
    out0 = jax.block_until_ready(cam_module(x, jnp.zeros((1,), jnp.float32)))
    assert jnp.allclose(out0, x, atol=1e-6, rtol=1e-6)

    print("KERNEL_OK")
</pallas_src>

<mosaic_0001>
module attributes {stable_mosaic.version = 11 : i64} {
  func.func @_cam_kernel(%arg0: i32, %arg1: i32, %arg2: i32, %arg3: memref<1xf32, #tpu.memory_space<smem>>, %arg4: memref<1x4x256xf32, #tpu.memory_space<vmem>>, %arg5: memref<1x4x256xf32, #tpu.memory_space<vmem>>, %arg6: memref<1x4x4xf32, #tpu.memory_space<vmem>>) attributes {dimension_semantics = [#tpu.dimension_semantics<parallel>, #tpu.dimension_semantics<arbitrary>, #tpu.dimension_semantics<arbitrary>], iteration_bounds = array<i64: 2, 2, 1>, scalar_prefetch = 0 : i64, scratch_operands = 1 : i64, tpu.core_type = #tpu.core_type<tc>, window_params = [{transform_indices = @transform_0, window_bounds = array<i64: 1>}, {transform_indices = @transform_1, window_bounds = array<i64: 1, 4, 256>}, {transform_indices = @transform_2, window_bounds = array<i64: 1, 4, 256>}]} {
    %c0 = arith.constant 0 : index
    %c0_0 = arith.constant 0 : index
    %c0_1 = arith.constant 0 : index
    %0 = vector.load %arg4[%c0, %c0_0, %c0_1] : memref<1x4x256xf32, #tpu.memory_space<vmem>>, vector<1x4x256xf32>
    %c0_i32 = arith.constant 0 : i32
    %1 = arith.cmpi eq, %arg1, %c0_i32 : i32
    %2 = arith.extui %1 : i1 to i32
    %c0_i32_2 = arith.constant 0 : i32
    %3 = arith.cmpi ne, %2, %c0_i32_2 : i32
    scf.if %3 {
      "tpu.trace_start"() <{level = 10 : i32, message = "bcn,bdn->bcd"}> : () -> ()
      %cst = arith.constant dense<0.000000e+00> : vector<1x4x4xf32>
      %14 = tpu.matmul %0, %0, %cst {dimension_numbers = #tpu.dot_dimension_numbers<[2], [2], [1], [1], [0, 0, 0, 1, 1, 1], [0], [0]>} : vector<1x4x256xf32>, vector<1x4x256xf32>, vector<1x4x4xf32> -> vector<1x4x4xf32>
      "tpu.trace_stop"() : () -> ()
      %c0_8 = arith.constant 0 : index
      %c0_9 = arith.constant 0 : index
      %c0_10 = arith.constant 0 : index
      %15 = vector.load %arg6[%c0_8, %c0_9, %c0_10] : memref<1x4x4xf32, #tpu.memory_space<vmem>>, vector<1x4x4xf32>
      tpu.vector_store %arg6[%c0_8, %c0_9, %c0_10], %14 {strides = array<i32>} : memref<1x4x4xf32, #tpu.memory_space<vmem>>, vector<1x4x4xf32>,
    } else {
    }
    %c1_i32 = arith.constant 1 : i32
    %4 = arith.cmpi eq, %arg1, %c1_i32 : i32
    %c0_i32_3 = arith.constant 0 : i32
    %5 = arith.cmpi eq, %arg2, %c0_i32_3 : i32
    %6 = arith.andi %4, %5 : i1
    %7 = arith.extui %6 : i1 to i32
    %c0_i32_4 = arith.constant 0 : i32
    %8 = arith.cmpi ne, %7, %c0_i32_4 : i32
    scf.if %8 {
      %c0_8 = arith.constant 0 : index
      %14 = memref.load %arg3[%c0_8] : memref<1xf32, #tpu.memory_space<smem>>
      %c0_9 = arith.constant 0 : index
      %c0_10 = arith.constant 0 : index
      %c0_11 = arith.constant 0 : index
      %15 = vector.load %arg6[%c0_9, %c0_10, %c0_11] : memref<1x4x4xf32, #tpu.memory_space<vmem>>, vector<1x4x4xf32>
      %cst = arith.constant dense<0x7F800000> : vector<1x4xf32>
      %16 = vector.multi_reduction <minimumf>, %15, %cst [2] : vector<1x4x4xf32> to vector<1x4xf32>
      %17 = vector.shape_cast %16 : vector<1x4xf32> to vector<1x4x1xf32>
      %18 = vector.broadcast %17 : vector<1x4x1xf32> to vector<1x4x4xf32>
      %19 = arith.subf %18, %15 : vector<1x4x4xf32>
      %20 = math.exp %19 : vector<1x4x4xf32>
      %cst_12 = arith.constant dense<0.000000e+00> : vector<1x4xf32>
      %21 = vector.multi_reduction <add>, %20, %cst_12 [2] : vector<1x4x4xf32> to vector<1x4xf32>
      %22 = vector.shape_cast %21 : vector<1x4xf32> to vector<1x4x1xf32>
      %cst_13 = arith.constant 1.000000e+00 : f32
      %23 = vector.broadcast %cst_13 : f32 to vector<1x4x1xf32>
      %24 = arith.divf %23, %22 : vector<1x4x1xf32>
      %25 = vector.broadcast %24 : vector<1x4x1xf32> to vector<1x4x4xf32>
      %26 = arith.mulf %20, %25 : vector<1x4x4xf32>
      %27 = vector.broadcast %14 : f32 to vector<1x4x4xf32>
      %28 = arith.mulf %26, %27 : vector<1x4x4xf32>
      "tpu.trace_start"() <{level = 10 : i32, message = "bcd,bdn->bcn"}> : () -> ()
      %cst_14 = arith.constant dense<0.000000e+00> : vector<1x4x256xf32>
      %29 = tpu.matmul %28, %0, %cst_14 {dimension_numbers = #tpu.dot_dimension_numbers<[2], [1], [1], [2], [0, 0, 0, 1, 1, 2], [0], [0]>} : vector<1x4x4xf32>, vector<1x4x256xf32>, vector<1x4x256xf32> -> vector<1x4x256xf32>
      "tpu.trace_stop"() : () -> ()
      %30 = arith.addf %29, %0 : vector<1x4x256xf32>
      %c0_15 = arith.constant 0 : index
      %c0_16 = arith.constant 0 : index
      %c0_17 = arith.constant 0 : index
      %31 = vector.load %arg5[%c0_15, %c0_16, %c0_17] : memref<1x4x256xf32, #tpu.memory_space<vmem>>, vector<1x4x256xf32>
      tpu.vector_store %arg5[%c0_15, %c0_16, %c0_17], %30 {strides = array<i32>} : memref<1x4x256xf32, #tpu.memory_space<vmem>>, vector<1x4x256xf32>,
    } else {
    }
    %c1_i32_5 = arith.constant 1 : i32
    %9 = arith.cmpi eq, %arg1, %c1_i32_5 : i32
    %c0_i32_6 = arith.constant 0 : i32
    %10 = arith.cmpi sgt, %arg2, %c0_i32_6 : i32
    %11 = arith.andi %9, %10 : i1
    %12 = arith.extui %11 : i1 to i32
    %c0_i32_7 = arith.constant 0 : i32
    %13 = arith.cmpi ne, %12, %c0_i32_7 : i32
    scf.if %13 {
      %c0_8 = arith.constant 0 : index
      %c0_9 = arith.constant 0 : index
      %c0_10 = arith.constant 0 : index
      %14 = vector.load %arg6[%c0_8, %c0_9, %c0_10] : memref<1x4x4xf32, #tpu.memory_space<vmem>>, vector<1x4x4xf32>
      "tpu.trace_start"() <{level = 10 : i32, message = "bcd,bdn->bcn"}> : () -> ()
      %cst = arith.constant dense<0.000000e+00> : vector<1x4x256xf32>
      %15 = tpu.matmul %14, %0, %cst {dimension_numbers = #tpu.dot_dimension_numbers<[2], [1], [1], [2], [0, 0, 0, 1, 1, 2], [0], [0]>} : vector<1x4x4xf32>, vector<1x4x256xf32>, vector<1x4x256xf32> -> vector<1x4x256xf32>
      "tpu.trace_stop"() : () -> ()
      %16 = arith.addf %15, %0 : vector<1x4x256xf32>
      %c0_11 = arith.constant 0 : index
      %c0_12 = arith.constant 0 : index
      %c0_13 = arith.constant 0 : index
      %17 = vector.load %arg5[%c0_11, %c0_12, %c0_13] : memref<1x4x256xf32, #tpu.memory_space<vmem>>, vector<1x4x256xf32>
      tpu.vector_store %arg5[%c0_11, %c0_12, %c0_13], %16 {strides = array<i32>} : memref<1x4x256xf32, #tpu.memory_space<vmem>>, vector<1x4x256xf32>,
    } else {
    }
    return
  }
  func.func @transform_0(%arg0: i32, %arg1: i32, %arg2: i32) -> i32 {
    %c0_i32 = arith.constant 0 : i32
    %c0_i32_0 = arith.constant 0 : i32
    return %c0_i32 : i32
  }
  func.func @transform_1(%arg0: i32, %arg1: i32, %arg2: i32) -> (i32, i32, i32) {
    %c0_i32 = arith.constant 0 : i32
    %c0_i32_0 = arith.constant 0 : i32
    return %arg0, %c0_i32, %arg2 : i32, i32, i32
  }
  func.func @transform_2(%arg0: i32, %arg1: i32, %arg2: i32) -> (i32, i32, i32) {
    %0 = arith.muli %arg2, %arg1 : i32
    %c0_i32 = arith.constant 0 : i32
    %c0_i32_0 = arith.constant 0 : i32
    return %arg0, %c0_i32, %0 : i32, i32, i32
  }
}

</mosaic_0001>

<bundles_post_ra>
// kernel: tpu_custom_call.1
= control target key start
LH: loop header
LB: loop body
LE: loop exit
PB: predicated region body
PF: predicated region fallthrough
CT: control target
= control target key end

     0   :  { %s936_s0 = inlined_call_operand.<no memory space> [shape: f32[1], index: 0, kind: input, shape index: {}]   ;;  %s937_s1 = inlined_call_operand.hbm [shape: f32[2,4,256], index: 1, kind: input, shape index: {}]   ;;  %s938_s2 = inlined_call_operand.hbm [shape: f32[2,4,256], index: 2, kind: output, shape index: {}]  }
   0x1   :  { %7 = sst [smem:[#allocation3]] %s936_s0 }
   0x2   :  { %8 = vsyncpa [#allocation5], 0 }
   0x3   :  { %10 = vsyncpa [#allocation5 + $0x1], 0 }
   0x4   :  { %11 = vsyncpa [#allocation6], 0 }
   0x5   :  { %13 = vsyncpa [#allocation6 + $0x1], 0  ;;  %s789_s11 = smov 0   ;;  %s791_s12 = smov 0  }
   0x6   :  { %s793_s13 = smov 0   ;;  %s795_s14 = smov 0  }
   0x7   :  { %s797_s15 = smov 0   ;;  %s799_s16 = smov 0  }
   0x8   :  { %s801_s17 = smov 0   ;;  %s803_s18 = smov 0  }
   0x9 LB: > { %s531_s0 = sadd.s32 4294967295, %s769_s18   ;;  %s532_s19 = sadd.s32 4294967294, %s769_s18   ;;  %s769_s18 = sphi %s803_s18, %s19_s18   ;;  %s765_s17 = sphi %s801_s17, %s949_s17   ;;  %s761_s16 = sphi %s799_s16, %s948_s16   ;;  %s757_s15 = sphi %s797_s15, %s947_s15   ;;  %s753_s14 = sphi %s795_s14, %s946_s14   ;;  %s749_s13 = sphi %s793_s13, %s945_s13   ;;  %s745_s12 = sphi %s791_s12, %s944_s12   ;;  %s741_s11 = sphi %s789_s11, %s943_s11  }
   0xa   : > { %s34_s20 = sadd.s32 1, %s761_s16  ;;  %s38_s21 = sadd.s32 1, %s765_s17 }
   0xb   : > { %p36_p0 = scmp.ge.s32.totalorder %s34_s20, 2  ;;  %s68_s22 = sadd.s32 1, %s749_s13 }
   0xc   : > { %p75_p1 = scmp.ne.s32.totalorder %s749_s13, %s745_s12  ;;  %p76_p2 = scmp.eq.s32.totalorder %s769_s18, 0 }
   0xd   : > { %s951_s20 = smov (%p36_p0, %s34_s20), 0  ;;  %s953_s21 = smov (!%p36_p0, %s38_s21), %s765_s17 }
   0xe   : > { %p840_p3 = por %p76_p2, %p75_p1  ;;  %p81_p4 = scmp.ne.s32.totalorder %s745_s12, %s741_s11 }
   0xf   : > { %p40_p5 = scmp.ge.s32.totalorder %s953_s21, 2  ;;  %p82_p6 = scmp.eq.s32.totalorder %s531_s0, 0 }
  0x10   : > { %p109_p7 = scmp.eq.s32.totalorder %s531_s0, 3  ;;  %p115_p8 = scmp.eq.s32.totalorder %s532_s19, 3 }
  0x11   : > { %s955_s21 = smov (%p40_p5, %s953_s21), 0  ;;  %p848_p9 = por %p82_p6, %p81_p4 }
  0x12   : > { %p852_p10 = por %p109_p7, %p75_p1  ;;  %s63_s26 = ssub.s32 %s765_s17, %s955_s21 }
  0x13   : > { %p858_p11 = por %p115_p8, %p81_p4  ;;  %p66_p12 = scmp.eq.s32.totalorder %s63_s26, 0 }
  0x14   : > { %p571_p13 = scmp.lt.s32.totalorder %s769_s18, 4  ;;  %s138_s28 = sand.u32 1, %s749_s13  }
  0x15   : > { %s865_s29 = scalar_select %p66_p12, %s749_s13, %s68_s22  }
  0x16   : > { %s535_s30 = sshll.u32 %s138_s28, 3  ;;  %s556_s3 = sshll.u32 %s765_s17, 3 }
  0x17   : > { %s149_s6 = scalar_lea.hbm %s937_s1, %s556_s3  ;;  %s142_s7 = scalar_lea.vmem [#allocation4], %s535_s30 }
  0x18   : > { %s153_s8 = sshll.u32 %s142_s7, 4  ;;  %s151_s9 = sshll.u32 %s149_s6, 4  ;;  %s154_s8 = int_to_ptr.vmem [resolvable:$true] %s153_s8  ;;  %s152_s9 = int_to_ptr.hbm [resolvable:$true] %s151_s9 }
  0x19   : > { %p564_p0 = pnand %p571_p13, %p840_p3  ;;  %p538_p1 = scmp.ge.s32.totalorder %s769_s18, 1 }
  0x1a   : > { %p158_p2 = scmp.lt.s32.totalorder %s769_s18, 5  ;;  %s139_s10 = scalar_lea.sflag [#allocation5], %s138_s28 }
  0x1b   : > { %566 = dma.hbm_to_vmem [thread:$0]  (!%p564_p0), %s152_s9, 128, %s154_s8, %s139_s10  }
  0x1c   : > { %p159_p4 = pnand %p538_p1, %p158_p2 }
  0x1d   : > { %s876_s0 = sand.u32 (!%p159_p4), 1, %s745_s12  }
  0x1e   : > { %162 = sbr.rel (%p159_p4) target bundleno = 611 (0x263), region = 28  ;;  %s539_s19 = sshll.u32 (!%p159_p4), %s876_s0, 3 }
  0x1f   : > { %s165_s22 = scalar_lea.sflag (!%p159_p4), [#allocation5], %s876_s0  ;;  %s168_s26 = scalar_lea.vmem (!%p159_p4), [#allocation4], %s539_s19 }
  0x23   : > { %732 = dma.done.wait (%p848_p9), %s165_s22, 128  }
  0x24   : > { %734 = vsyncadd (%p848_p9), %s165_s22, 4294967168  ;;  %v193_v0 = vld [vmem:[%s168_s26] sm:$0xff]  ;;  %s884_s23 = scalar_lea.vmem [#allocation7], %s539_s19  ;;  %p541_p3 = scmp.ne.s32.totalorder %s753_s14, 0 }
  0x26   : > { %197 = sbr.rel (%p541_p3) target bundleno = 191 (0xbf), region = 36 }
  0x2b   : > { %199 = vst [vmem:[#allocation1] ss:$2 sm:$0xff] %v193_v0  ;;  %vm249_vm0 = vcmask 27648  }
  0x32   : > { %v200_v1 = vld.sshfl [vmem:[#allocation1] sm:$0xff pattern:$0x75316420]  ;;  %v201_v2 = vld.sshfl [vmem:[#allocation1 + $0x8] sm:$0xff pattern:$0x75316420] }
  0x33   : > { %204 = vst [vmem:[#allocation1] ss:$2 sm:$0xff] %v193_v0 }
  0x3a   : > { %v205_v3 = vld.sshfl [vmem:[#allocation1] sm:$0xff pattern:$0x75316420]  ;;  %v206_v4 = vld.sshfl [vmem:[#allocation1 + $0x8] sm:$0xff pattern:$0x75316420] }
  0x3b   : > { %224 = vmatpush.xpose.msra.mxu0 %v205_v3  ;;  %244 = vmatpush.xpose.msra.mxu1 %v206_v4 }
  0x3e   : > { %225 = vmatmul.f32.vlgmr.msra.gmra.mxu0 %v200_v1  ;;  %245 = vmatmul.f32.vlgmr.msra.gmra.mxu1 %v201_v2 }
  0xbb   : > { %v226_v5 = vpop.f32.mrf.mxu0  ;;  %v246_v6 = vpop.f32.mrf.mxu1 }
  0xbc   : > { %v247_v7 = vadd.f32 %v246_v6, %v226_v5 }
  0xbe   : > { %250 = vst.msk [vmem:[#allocation2] sm:$0xf] %vm249_vm0, %v247_v7 }
  0xbf PF: > { %p251_p5 = scmp.eq.s32.totalorder %s753_s14, 1 }
  0xc0   : > { %vm259_vm1 = vcmask (%p251_p5), 27648   ;;  %288 = vst [vmem:[#allocation1] ss:$2 sm:$0xff] (%p251_p5), %v193_v0  ;;  %vm300_vm2 = vcmask (%p251_p5), 1043456   ;;  %s257_s14 = sld [smem:[#allocation3]] (%p251_p5)  ;;  %vm296_vm7 = vcmask (%p251_p5), 31744  }
  0xc1   : > { %256 = sbr.rel (!%p251_p5) target bundleno = 596 (0x254), region = 40 }
  0xc5   : > { %v258_v8 = vld [vmem:[#allocation2] sm:$0xf] (%p251_p5) }
  0xc6   : > { %v260_v9 = vsel %vm259_vm1, %v258_v8, inf  ;;  %v285_v28 = vstv %s257_s14 }
  0xc7   : > { %261 = vmin.xlane.f32.xlu0 %v260_v9  ;;  %v289_v15 = vld.sshfl [vmem:[#allocation1] sm:$0xff pattern:$0x75316420]  ;;  %v290_v16 = vld.sshfl [vmem:[#allocation1 + $0x8] sm:$0xff pattern:$0x75316420] }
  0xc8   : > { %543 = vmatpush.msk.msra.mxu0 %vm300_vm2, %v289_v15  ;;  %291 = vst [vmem:[#allocation1] ss:$2 sm:$0xff] %v193_v0  ;;  %545 = vmatpush.msk.msra.mxu1 %vm300_vm2, %v290_v16 }
  0xcf   : > { %v293_v31 = vld.sshfl [vmem:[#allocation1 + $0x8] sm:$0xff pattern:$0x75316420]  ;;  %v292_v32 = vld.sshfl [vmem:[#allocation1] sm:$0xff pattern:$0x75316420] }
 0x13a   : > { %v262_v10 = vpop.xlane.xlu0 %261 }
 0x13b   : > { %v263_v11 = vsub.f32 %v262_v10, %v258_v8 }
 0x13d   : > { %v264_v12 = vmul.f32 1.442695, %v263_v11 }
 0x13f   : > { %637 = vpow2.f32 %v264_v12 }
 0x145   : > { %v638_v13 = vpop.eup %637 }
 0x146   : > { %v266_v14 = vsel %vm259_vm1, %v638_v13, 0.0 }
 0x147   : > { %267 = vadd.xlane.f32.xlu0 %v266_v14 }
 0x1ba   : > { %v268_v17 = vpop.xlane.xlu0 %267 }
 0x1bb   : > { %639 = vrcp.f32 %v268_v17  ;;  %v280_v21 = vand.u32 2147483648, %v268_v17  ;;  %v278_v23 = vand.u32 2147483647, %v268_v17  ;;  %vm274_vm4 = vweird.f32 %v268_v17 }
 0x1bd   : > { %v281_v25 = vor.u32 1.1754944e-38, %v280_v21  ;;  %vm279_vm6 = vcmp.eq.f32.partialorder %v278_v23, 8.507059e+37 }
 0x1c1   : > { %v640_v18 = vpop.eup %639 }
 0x1c2   : > { %v270_v19 = vmul.f32 %v640_v18, %v268_v17  ;;  %vm275_vm3 = vweird.f32 %v640_v18 }
 0x1c3   : > { %vm276_vm5 = vmor %vm274_vm4, %vm275_vm3 }
 0x1c4   : > { %v271_v20 = vsub.f32 1.0, %v270_v19 }
 0x1c6   : > { %v272_v22 = vmul.f32 %v640_v18, %v271_v20 }
 0x1c8   : > { %v273_v24 = vadd.f32 %v640_v18, %v272_v22 }
 0x1ca   : > { %v277_v26 = vsel %vm276_vm5, %v640_v18, %v273_v24 }
 0x1cb   : > { %v282_v27 = vsel %vm279_vm6, %v281_v25, %v277_v26 }
 0x1cc   : > { %v284_v29 = vmul.f32 %v638_v13, %v282_v27 }
 0x1ce   : > { %v286_v30 = vmul.f32 %v285_v28, %v284_v29 }
 0x1d0   : > { %544 = vmatmul.msk.f32.vlgmr.msra.gmra.mxu0 %vm296_vm7, %v286_v30  ;;  %546 = vmatmul.msk.f32.vlgmr.msra.gmra.mxu1 %vm296_vm7, %v286_v30 }
 0x24d   : > { %v322_v33 = vpop.f32.mrf.mxu0  ;;  %v342_v34 = vpop.f32.mrf.mxu1 }
 0x24e   : > { %v343_v35 = vadd.f32 %v342_v34, %v293_v31  ;;  %v323_v36 = vadd.f32 %v322_v33, %v292_v32 }
 0x250   : > { %v347_v37 = vrot.slane %v343_v35, 4 }
 0x252   : > { %v348_v38 = vsel %vm300_vm2, %v323_v36, %v347_v37 }
 0x253   : > { %350 = vst [vmem:[%s884_s23] sm:$0xff] %v348_v38 }
 0x254 PF: > { %s558_s24 = sshll.u32 %s757_s15, 3  ;;  %s438_s4 = sshll.u32 %s884_s23, 4  ;;  %s439_s4 = int_to_ptr.vmem [resolvable:$true] %s438_s4 }
 0x255   : > { %s436_s3 = scalar_lea.hbm %s938_s2, %s558_s24  ;;  %s422_s6 = scalar_lea.sflag [#allocation6], %s876_s0 }
 0x256   : > { %s440_s5 = sshll.u32 %s436_s3, 4  ;;  %s691_s15 = scalar_lea.hbm %s938_s2, 16  ;;  %s441_s5 = int_to_ptr.hbm [resolvable:$true] %s440_s5 }
 0x257   : > { %s685_s7 = sshra.s32 %s441_s5, 4  ;;  %s686_s7 = int_to_ptr.hbm [resolvable:$true] %s685_s7 }
 0x258   : > { %s687_s8 = scalar_lea.hbm %s686_s7, 8  ;;  %p692_p9 = scmp.lt.s32.totalorder %s686_s7, %s938_s2 }
 0x259   : > { %p688_p6 = scmp.ne.s32.totalorder %s686_s7, %s687_s8  ;;  %p693_p12 = scmp.lt.s32.totalorder %s691_s15, %s687_s8 }
 0x25b   : > { %p689_p7 = pnand %p688_p6, %p852_p10  ;;  %p694_p13 = por %p693_p12, %p692_p9 }
 0x25d   : > { %p690_p8 = pneg %p689_p7 }
 0x25f   : > { %p695_p0 = pnand %p694_p13, %p690_p8 }
 0x261   : > { %698 = shalt.err (!%p695_p0)
}
 0x262   : > { %561 = dma.vmem_to_hbm [thread:$0]  (%p852_p10), %s439_s4, 128, %s441_s5, %s422_s6  }
 0x263 PF: > { %p572_p1 = scmp.ge.s32.totalorder %s769_s18, 2  ;;  %s452_s0 = sand.u32 1, %s741_s11  }
 0x264   : > { %s453_s26 = scalar_lea.sflag [#allocation6], %s452_s0 }
 0x265   : > { %p568_p2 = pnand %p572_p1, %p858_p11 }
 0x267   : > { %p569_p4 = pneg %p568_p2 }
 0x269   : > { %736 = dma.done.wait (%p569_p4), %s453_s26, 128  }
 0x26a   : > { %738 = vsyncadd (%p569_p4), %s453_s26, 4294967168  ;;  %s19_s18 = sadd.s32 1, %s769_s18   ;;  %s943_s11 = smov %s745_s12 }
 0x26b   : > { %p16_p3 = scmp.ge.s32.totalorder %s19_s18, 6   ;;  %s944_s12 = smov %s749_s13 }
 0x26c   : > { %s945_s13 = smov %s865_s29  ;;  %s946_s14 = smov %s761_s16 }
 0x26d   : > { %s947_s15 = smov %s765_s17  ;;  %s948_s16 = smov %s951_s20 }
 0x26e   : > { %s949_s17 = smov %s955_s21  ;;  %18 = sbr.rel (!%p16_p3) target bundleno = 9 (0x9), region = 85 }
 0x273   :  { %459 = vsyncpa [#allocation5], 1 }
 0x274   :  { %461 = vsyncpa [#allocation5 + $0x1], 1 }
 0x275   :  { %462 = vsyncpa [#allocation6], 1 }
 0x276   :  { %464 = vsyncpa [#allocation6 + $0x1], 1 }

</bundles_post_ra>
